<compile_context>
chip_gen: v5e
topology: v5e:2x2
jax: 0.10.0
libtpu: 0.0.40
codegen_flags: <defaults>
</compile_context>

<pallas_src>
import jax
import jax.numpy as jnp
import numpy as np
from jax.experimental import pallas as pl
from jax.experimental.pallas import tpu as pltpu


def _round_up(x, m):
    return ((x + m - 1) // m) * m


def _gated_equivariant_kernel(s_ref, v_ref, w12t_ref, a1t_ref, b1_ref,
                              a2t_ref, b2_ref, s_out_ref, v_out_ref):
    TN, S = s_ref.shape
    V = w12t_ref.shape[0]
    cdt = w12t_ref.dtype                       # MXU operand dtype (bf16)

    v_all = v_ref[...]                         # (TN, 3V) == (N, 3, V) view
    w12t = w12t_ref[...]                       # (V, 2V) = [W1^T | W2^T]

    # ---- Equivariant projections ------------------------------------------
    # One M=TN, K=V, N=2V matmul per Cartesian component; the lane slices at
    # multiples of V (=128) are free, and one matmul yields both W1_v and
    # W2_v for that component.
    proj = [
        jnp.dot(v_all[:, k * V:(k + 1) * V].astype(cdt), w12t,
                preferred_element_type=jnp.float32)
        for k in range(3)
    ]
    w1x, w2x = proj[0][:, :V], proj[0][:, V:]
    w1y, w2y = proj[1][:, :V], proj[1][:, V:]
    w1z, w2z = proj[2][:, :V], proj[2][:, V:]

    # torch.linalg.norm(W1_v, dim=1): L2 norm over the Cartesian axis (f32).
    w1v_norm = jnp.sqrt(w1x * w1x + w1y * w1y + w1z * w1z)          # (TN, V)

    # ---- Gating MLP: Linear -> SiLU -> Linear ------------------------------
    # Lane-aligned concat of [scalar | norm] -> single K = S+V matmul.
    mlp_in = jnp.concatenate([s_ref[...].astype(cdt), w1v_norm.astype(cdt)],
                             axis=-1)                                # (TN, L)
    h = jnp.dot(mlp_in, a1t_ref[...],
                preferred_element_type=jnp.float32) + b1_ref[...]
    h = h * jax.nn.sigmoid(h)                                        # SiLU (f32)
    out = jnp.dot(h.astype(cdt), a2t_ref[...],
                  preferred_element_type=jnp.float32) + b2_ref[...]  # (TN, L)

    s_out_ref[...] = out[:, :S].astype(s_out_ref.dtype)

    # ---- v_new = v_filter[:, None, :] * W2_v --------------------------------
    # Three lane-offset slab stores into the (TN, 3V) output view.
    v_filter = out[:, S:]                                            # (TN, V)
    v_out_ref[:, 0 * V:1 * V] = (v_filter * w2x).astype(v_out_ref.dtype)
    v_out_ref[:, 1 * V:2 * V] = (v_filter * w2y).astype(v_out_ref.dtype)
    v_out_ref[:, 2 * V:3 * V] = (v_filter * w2z).astype(v_out_ref.dtype)


def gated_equivariant_block(node_state_scalar, node_state_vector, params,
                            *, tile_nodes=512, min_grid_steps=4,
                            compute_dtype=jnp.bfloat16):
    N, S = node_state_scalar.shape
    _, three, V = node_state_vector.shape
    assert three == 3
    L = S + V
    out_dtype = node_state_scalar.dtype

    # Node tile: large (amortizes ~0.35us/step pipeline overhead, tall MXU M),
    # multiple of 8, but capped so the "parallel" grid keeps >= min_grid_steps
    # steps whenever N permits (keeps both v7x TensorCores busy).
    tn = min(_round_up(tile_nodes, 8),
             max(8, _round_up(pl.cdiv(N, min_grid_steps), 8)),
             _round_up(N, 8))
    grid = (pl.cdiv(N, tn),)

    # PyTorch (N, 3, V) tensor viewed as contiguous (N, 3*V): free reshape,
    # no HBM transpose on the way in or out.
    v2d = node_state_vector.reshape(N, 3 * V)

    # Weights pre-cast once to the MXU operand dtype; biases stay f32
    # (they are added to f32 accumulators).
    cdt = compute_dtype
    w12t = jnp.concatenate([params["W1"].T, params["W2"].T],
                           axis=1).astype(cdt)                     # (V, 2V)
    a1t = params["A1"].T.astype(cdt)                               # (L, L)
    b1 = params["b1"].reshape(1, L).astype(jnp.float32)
    a2t = params["A2"].T.astype(cdt)                               # (L, L)
    b2 = params["b2"].reshape(1, L).astype(jnp.float32)

    s_out, v_out = pl.pallas_call(
        _gated_equivariant_kernel,
        out_shape=(jax.ShapeDtypeStruct((N, S), out_dtype),
                   jax.ShapeDtypeStruct((N, 3 * V), out_dtype)),
        grid_spec=pltpu.PrefetchScalarGridSpec(
            num_scalar_prefetch=0,
            grid=grid,
            in_specs=[
                pl.BlockSpec((tn, S), lambda i: (i, 0)),          # scalars
                pl.BlockSpec((tn, 3 * V), lambda i: (i, 0)),      # vectors (N,3V) view
                pl.BlockSpec((V, 2 * V), lambda i: (0, 0)),       # [W1^T | W2^T]
                pl.BlockSpec((L, L), lambda i: (0, 0)),           # A1^T
                pl.BlockSpec((1, L), lambda i: (0, 0)),           # b1
                pl.BlockSpec((L, L), lambda i: (0, 0)),           # A2^T
                pl.BlockSpec((1, L), lambda i: (0, 0)),           # b2
            ],
            out_specs=[
                pl.BlockSpec((tn, S), lambda i: (i, 0)),
                pl.BlockSpec((tn, 3 * V), lambda i: (i, 0)),
            ],
        ),
        compiler_params=pltpu.CompilerParams(
            dimension_semantics=("parallel",)),
    )(node_state_scalar, v2d, w12t, a1t, b1, a2t, b2)

    # Free reshape back to the PyTorch layout (N, 3, V).
    return s_out, v_out.reshape(N, 3, V)


def _reference(node_state_scalar, node_state_vector, params):
    """Pure-JAX f32 reference mirroring the PyTorch forward exactly."""
    W1_v = jnp.einsum("nkv,ov->nko", node_state_vector, params["W1"])
    W2_v = jnp.einsum("nkv,ov->nko", node_state_vector, params["W2"])
    W1_v_norm = jnp.linalg.norm(W1_v, axis=1)
    mlp_in = jnp.concatenate([node_state_scalar, W1_v_norm], axis=1)
    h = mlp_in @ params["A1"].T + params["b1"]
    h = h * jax.nn.sigmoid(h)
    out = h @ params["A2"].T + params["b2"]
    S = node_state_scalar.shape[1]
    s_new, v_filter = out[:, :S], out[:, S:]
    v_new = v_filter[:, None, :] * W2_v
    return s_new, v_new


def _init_params(key, vector_size, scalar_size):
    L = vector_size + scalar_size
    ks = jax.random.split(key, 6)

    def uni(k, shape, fan_in):
        bound = 1.0 / np.sqrt(fan_in)
        return jax.random.uniform(k, shape, jnp.float32, -bound, bound)

    return {
        "W1": uni(ks[0], (vector_size, vector_size), vector_size),
        "W2": uni(ks[1], (vector_size, vector_size), vector_size),
        "A1": uni(ks[2], (L, L), L),
        "b1": uni(ks[3], (L,), L),
        "A2": uni(ks[4], (L, L), L),
        "b2": uni(ks[5], (L,), L),
    }


if __name__ == "__main__":
    num_nodes, node_size = 16, 128
    key = jax.random.PRNGKey(0)
    k_s, k_v, k_p = jax.random.split(key, 3)

    node_state_scalar = jax.random.normal(k_s, (num_nodes, node_size),
                                          jnp.float32)
    node_state_vector = jax.random.normal(k_v, (num_nodes, 3, node_size),
                                          jnp.float32)
    params = _init_params(k_p, node_size, node_size)

    s_new, v_new = gated_equivariant_block(node_state_scalar,
                                           node_state_vector, params)
    jax.block_until_ready((s_new, v_new))

    s_ref, v_ref = _reference(node_state_scalar, node_state_vector, params)
    assert s_new.shape == (num_nodes, node_size)
    assert v_new.shape == (num_nodes, 3, node_size)
    # bf16 MXU operands with f32 accumulation -> loosened tolerances.
    np.testing.assert_allclose(np.asarray(s_new), np.asarray(s_ref),
                               rtol=2e-2, atol=2e-2)
    np.testing.assert_allclose(np.asarray(v_new), np.asarray(v_ref),
                               rtol=2e-2, atol=2e-2)

    print("KERNEL_OK")
</pallas_src>

<mosaic_0001>
module attributes {stable_mosaic.version = 11 : i64} {
  func.func @_gated_equivariant_kernel(%arg0: i32, %arg1: memref<8x128xf32, #tpu.memory_space<vmem>>, %arg2: memref<8x384xf32, #tpu.memory_space<vmem>>, %arg3: memref<128x256xbf16, #tpu.memory_space<vmem>>, %arg4: memref<256x256xbf16, #tpu.memory_space<vmem>>, %arg5: memref<1x256xf32, #tpu.memory_space<vmem>>, %arg6: memref<256x256xbf16, #tpu.memory_space<vmem>>, %arg7: memref<1x256xf32, #tpu.memory_space<vmem>>, %arg8: memref<8x128xf32, #tpu.memory_space<vmem>>, %arg9: memref<8x384xf32, #tpu.memory_space<vmem>>) attributes {dimension_semantics = [#tpu.dimension_semantics<parallel>], iteration_bounds = array<i64: 2>, scalar_prefetch = 0 : i64, scratch_operands = 0 : i64, tpu.core_type = #tpu.core_type<tc>, window_params = [{transform_indices = @transform_0, window_bounds = array<i64: 8, 128>}, {transform_indices = @transform_1, window_bounds = array<i64: 8, 384>}, {pipeline_mode = #tpu.pipeline_mode<synchronous>, transform_indices = @transform_2, window_bounds = array<i64: 128, 256>}, {pipeline_mode = #tpu.pipeline_mode<synchronous>, transform_indices = @transform_3, window_bounds = array<i64: 256, 256>}, {pipeline_mode = #tpu.pipeline_mode<synchronous>, transform_indices = @transform_4, window_bounds = array<i64: 1, 256>}, {pipeline_mode = #tpu.pipeline_mode<synchronous>, transform_indices = @transform_5, window_bounds = array<i64: 256, 256>}, {pipeline_mode = #tpu.pipeline_mode<synchronous>, transform_indices = @transform_6, window_bounds = array<i64: 1, 256>}, {transform_indices = @transform_7, window_bounds = array<i64: 8, 128>}, {transform_indices = @transform_8, window_bounds = array<i64: 8, 384>}]} {
    %c0 = arith.constant 0 : index
    %c0_0 = arith.constant 0 : index
    %0 = vector.load %arg2[%c0, %c0_0] : memref<8x384xf32, #tpu.memory_space<vmem>>, vector<8x384xf32>
    %c0_1 = arith.constant 0 : index
    %c0_2 = arith.constant 0 : index
    %1 = vector.load %arg3[%c0_1, %c0_2] : memref<128x256xbf16, #tpu.memory_space<vmem>>, vector<128x256xbf16>
    %2 = vector.extract_strided_slice %0 {offsets = [0, 0], sizes = [8, 128], strides = [1, 1]} : vector<8x384xf32> to vector<8x128xf32>
    %3 = arith.truncf %2 : vector<8x128xf32> to vector<8x128xbf16>
    %cst = arith.constant dense<0.000000e+00> : vector<8x256xf32>
    %4 = tpu.matmul %3, %1, %cst {dimension_numbers = #tpu.dot_dimension_numbers<[1], [0], [0], [1], [0, 0, 1, 1], [], []>} : vector<8x128xbf16>, vector<128x256xbf16>, vector<8x256xf32> -> vector<8x256xf32>
    %5 = vector.extract_strided_slice %0 {offsets = [0, 128], sizes = [8, 128], strides = [1, 1]} : vector<8x384xf32> to vector<8x128xf32>
    %6 = arith.truncf %5 : vector<8x128xf32> to vector<8x128xbf16>
    %cst_3 = arith.constant dense<0.000000e+00> : vector<8x256xf32>
    %7 = tpu.matmul %6, %1, %cst_3 {dimension_numbers = #tpu.dot_dimension_numbers<[1], [0], [0], [1], [0, 0, 1, 1], [], []>} : vector<8x128xbf16>, vector<128x256xbf16>, vector<8x256xf32> -> vector<8x256xf32>
    %8 = vector.extract_strided_slice %0 {offsets = [0, 256], sizes = [8, 128], strides = [1, 1]} : vector<8x384xf32> to vector<8x128xf32>
    %9 = arith.truncf %8 : vector<8x128xf32> to vector<8x128xbf16>
    %cst_4 = arith.constant dense<0.000000e+00> : vector<8x256xf32>
    %10 = tpu.matmul %9, %1, %cst_4 {dimension_numbers = #tpu.dot_dimension_numbers<[1], [0], [0], [1], [0, 0, 1, 1], [], []>} : vector<8x128xbf16>, vector<128x256xbf16>, vector<8x256xf32> -> vector<8x256xf32>
    %11 = vector.extract_strided_slice %4 {offsets = [0, 0], sizes = [8, 128], strides = [1, 1]} : vector<8x256xf32> to vector<8x128xf32>
    %12 = vector.extract_strided_slice %4 {offsets = [0, 128], sizes = [8, 128], strides = [1, 1]} : vector<8x256xf32> to vector<8x128xf32>
    %13 = vector.extract_strided_slice %7 {offsets = [0, 0], sizes = [8, 128], strides = [1, 1]} : vector<8x256xf32> to vector<8x128xf32>
    %14 = vector.extract_strided_slice %7 {offsets = [0, 128], sizes = [8, 128], strides = [1, 1]} : vector<8x256xf32> to vector<8x128xf32>
    %15 = vector.extract_strided_slice %10 {offsets = [0, 0], sizes = [8, 128], strides = [1, 1]} : vector<8x256xf32> to vector<8x128xf32>
    %16 = vector.extract_strided_slice %10 {offsets = [0, 128], sizes = [8, 128], strides = [1, 1]} : vector<8x256xf32> to vector<8x128xf32>
    %17 = arith.mulf %11, %11 : vector<8x128xf32>
    %18 = arith.mulf %13, %13 : vector<8x128xf32>
    %19 = arith.addf %17, %18 : vector<8x128xf32>
    %20 = arith.mulf %15, %15 : vector<8x128xf32>
    %21 = arith.addf %19, %20 : vector<8x128xf32>
    %22 = math.sqrt %21 : vector<8x128xf32>
    %c0_5 = arith.constant 0 : index
    %c0_6 = arith.constant 0 : index
    %23 = vector.load %arg1[%c0_5, %c0_6] : memref<8x128xf32, #tpu.memory_space<vmem>>, vector<8x128xf32>
    %24 = arith.truncf %23 : vector<8x128xf32> to vector<8x128xbf16>
    %25 = arith.truncf %22 : vector<8x128xf32> to vector<8x128xbf16>
    %26 = tpu.concatenate %24, %25 in 1 : vector<8x128xbf16>, vector<8x128xbf16> -> vector<8x256xbf16>
    %c0_7 = arith.constant 0 : index
    %c0_8 = arith.constant 0 : index
    %27 = vector.load %arg4[%c0_7, %c0_8] : memref<256x256xbf16, #tpu.memory_space<vmem>>, vector<256x256xbf16>
    %cst_9 = arith.constant dense<0.000000e+00> : vector<8x256xf32>
    %28 = tpu.matmul %26, %27, %cst_9 {dimension_numbers = #tpu.dot_dimension_numbers<[1], [0], [0], [1], [0, 0, 1, 1], [], []>} : vector<8x256xbf16>, vector<256x256xbf16>, vector<8x256xf32> -> vector<8x256xf32>
    %c0_10 = arith.constant 0 : index
    %c0_11 = arith.constant 0 : index
    %29 = vector.load %arg5[%c0_10, %c0_11] : memref<1x256xf32, #tpu.memory_space<vmem>>, vector<1x256xf32>
    %30 = vector.broadcast %29 : vector<1x256xf32> to vector<8x256xf32>
    %31 = arith.addf %28, %30 : vector<8x256xf32>
    %32 = arith.negf %31 : vector<8x256xf32>
    %33 = math.exp %32 : vector<8x256xf32>
    %cst_12 = arith.constant 1.000000e+00 : f32
    %34 = vector.broadcast %cst_12 : f32 to vector<8x256xf32>
    %35 = arith.addf %34, %33 : vector<8x256xf32>
    %36 = arith.divf %34, %35 : vector<8x256xf32>
    %37 = arith.mulf %31, %36 : vector<8x256xf32>
    %38 = arith.truncf %37 : vector<8x256xf32> to vector<8x256xbf16>
    %c0_13 = arith.constant 0 : index
    %c0_14 = arith.constant 0 : index
    %39 = vector.load %arg6[%c0_13, %c0_14] : memref<256x256xbf16, #tpu.memory_space<vmem>>, vector<256x256xbf16>
    %cst_15 = arith.constant dense<0.000000e+00> : vector<8x256xf32>
    %40 = tpu.matmul %38, %39, %cst_15 {dimension_numbers = #tpu.dot_dimension_numbers<[1], [0], [0], [1], [0, 0, 1, 1], [], []>} : vector<8x256xbf16>, vector<256x256xbf16>, vector<8x256xf32> -> vector<8x256xf32>
    %c0_16 = arith.constant 0 : index
    %c0_17 = arith.constant 0 : index
    %41 = vector.load %arg7[%c0_16, %c0_17] : memref<1x256xf32, #tpu.memory_space<vmem>>, vector<1x256xf32>
    %42 = vector.broadcast %41 : vector<1x256xf32> to vector<8x256xf32>
    %43 = arith.addf %40, %42 : vector<8x256xf32>
    %44 = vector.extract_strided_slice %43 {offsets = [0, 0], sizes = [8, 128], strides = [1, 1]} : vector<8x256xf32> to vector<8x128xf32>
    %c0_18 = arith.constant 0 : index
    %c0_19 = arith.constant 0 : index
    %45 = vector.load %arg8[%c0_18, %c0_19] : memref<8x128xf32, #tpu.memory_space<vmem>>, vector<8x128xf32>
    tpu.vector_store %arg8[%c0_18, %c0_19], %44 {strides = array<i32>} : memref<8x128xf32, #tpu.memory_space<vmem>>, vector<8x128xf32>,
    %46 = vector.extract_strided_slice %43 {offsets = [0, 128], sizes = [8, 128], strides = [1, 1]} : vector<8x256xf32> to vector<8x128xf32>
    %47 = arith.mulf %46, %12 : vector<8x128xf32>
    %c0_20 = arith.constant 0 : index
    %c0_21 = arith.constant 0 : index
    %48 = vector.load %arg9[%c0_20, %c0_21] : memref<8x384xf32, #tpu.memory_space<vmem>>, vector<8x128xf32>
    tpu.vector_store %arg9[%c0_20, %c0_21], %47 {strides = array<i32>} : memref<8x384xf32, #tpu.memory_space<vmem>>, vector<8x128xf32>,
    %49 = arith.mulf %46, %14 : vector<8x128xf32>
    %c0_22 = arith.constant 0 : index
    %c128 = arith.constant 128 : index
    %50 = vector.load %arg9[%c0_22, %c128] : memref<8x384xf32, #tpu.memory_space<vmem>>, vector<8x128xf32>
    tpu.vector_store %arg9[%c0_22, %c128], %49 {strides = array<i32>} : memref<8x384xf32, #tpu.memory_space<vmem>>, vector<8x128xf32>,
    %51 = arith.mulf %46, %16 : vector<8x128xf32>
    %c0_23 = arith.constant 0 : index
    %c256 = arith.constant 256 : index
    %52 = vector.load %arg9[%c0_23, %c256] : memref<8x384xf32, #tpu.memory_space<vmem>>, vector<8x128xf32>
    tpu.vector_store %arg9[%c0_23, %c256], %51 {strides = array<i32>} : memref<8x384xf32, #tpu.memory_space<vmem>>, vector<8x128xf32>,
    return
  }
  func.func @transform_0(%arg0: i32) -> (i32, i32) {
    %c0_i32 = arith.constant 0 : i32
    %c0_i32_0 = arith.constant 0 : i32
    return %arg0, %c0_i32 : i32, i32
  }
  func.func @transform_1(%arg0: i32) -> (i32, i32) {
    %c0_i32 = arith.constant 0 : i32
    %c0_i32_0 = arith.constant 0 : i32
    return %arg0, %c0_i32 : i32, i32
  }
  func.func @transform_2(%arg0: i32) -> (i32, i32) {
    %c0_i32 = arith.constant 0 : i32
    %c0_i32_0 = arith.constant 0 : i32
    %c0_i32_1 = arith.constant 0 : i32
    return %c0_i32, %c0_i32_0 : i32, i32
  }
  func.func @transform_3(%arg0: i32) -> (i32, i32) {
    %c0_i32 = arith.constant 0 : i32
    %c0_i32_0 = arith.constant 0 : i32
    %c0_i32_1 = arith.constant 0 : i32
    return %c0_i32, %c0_i32_0 : i32, i32
  }
  func.func @transform_4(%arg0: i32) -> (i32, i32) {
    %c0_i32 = arith.constant 0 : i32
    %c0_i32_0 = arith.constant 0 : i32
    %c0_i32_1 = arith.constant 0 : i32
    return %c0_i32, %c0_i32_0 : i32, i32
  }
  func.func @transform_5(%arg0: i32) -> (i32, i32) {
    %c0_i32 = arith.constant 0 : i32
    %c0_i32_0 = arith.constant 0 : i32
    %c0_i32_1 = arith.constant 0 : i32
    return %c0_i32, %c0_i32_0 : i32, i32
  }
  func.func @transform_6(%arg0: i32) -> (i32, i32) {
    %c0_i32 = arith.constant 0 : i32
    %c0_i32_0 = arith.constant 0 : i32
    %c0_i32_1 = arith.constant 0 : i32
    return %c0_i32, %c0_i32_0 : i32, i32
  }
  func.func @transform_7(%arg0: i32) -> (i32, i32) {
    %c0_i32 = arith.constant 0 : i32
    %c0_i32_0 = arith.constant 0 : i32
    return %arg0, %c0_i32 : i32, i32
  }
  func.func @transform_8(%arg0: i32) -> (i32, i32) {
    %c0_i32 = arith.constant 0 : i32
    %c0_i32_0 = arith.constant 0 : i32
    return %arg0, %c0_i32 : i32, i32
  }
}

</mosaic_0001>

<bundles_post_ra>
// kernel: tpu_custom_call.1
= control target key start
LH: loop header
LB: loop body
LE: loop exit
PB: predicated region body
PF: predicated region fallthrough
CT: control target
= control target key end

     0   :  { %s2458_s0 = inlined_call_operand.hbm [shape: f32[16,128], index: 0, kind: input, shape index: {}]   ;;  %s2459_s1 = inlined_call_operand.hbm [shape: f32[16,384], index: 1, kind: input, shape index: {}]   ;;  %s2460_s2 = inlined_call_operand.hbm [shape: bf16[128,256], index: 2, kind: input, shape index: {}]   ;;  %s2461_s3 = inlined_call_operand.hbm [shape: bf16[256,256], index: 3, kind: input, shape index: {}]   ;;  %s2462_s4 = inlined_call_operand.vmem [shape: f32[1,256], index: 4, kind: input, shape index: {}]   ;;  %s2463_s5 = inlined_call_operand.hbm [shape: bf16[256,256], index: 5, kind: input, shape index: {}]   ;;  %s2464_s6 = inlined_call_operand.vmem [shape: f32[1,256], index: 6, kind: input, shape index: {}]   ;;  %s2465_s7 = inlined_call_operand.hbm [shape: f32[16,128], index: 7, kind: output, shape index: {0}]   ;;  %s2466_s8 = inlined_call_operand.hbm [shape: f32[16,384], index: 8, kind: output, shape index: {1}]  }
   0x1   :  { %2472 = sst [smem:[#allocation25_spill]] %s2460_s2 }
   0x2   :  { %2473 = sst [smem:[#allocation26_spill]] %s2461_s3 }
   0x3   :  { %2474 = sst [smem:[#allocation27_spill]] %s2463_s5 }
   0x4   :  { %14 = vsyncpa [#allocation3], 0 }
   0x5   :  { %16 = vsyncpa [#allocation3 + $0x1], 0 }
   0x6   :  { %17 = vsyncpa [#allocation6], 0 }
   0x7   :  { %19 = vsyncpa [#allocation6 + $0x1], 0 }
   0x8   :  { %20 = vsyncpa [#allocation9], 0 }
   0x9   :  { %21 = vsyncpa [#allocation4], 0 }
   0xa   :  { %23 = vsyncpa [#allocation4 + $0x1], 0 }
   0xb   :  { %24 = vsyncpa [#allocation13], 0 }
   0xc   :  { %26 = vsyncpa [#allocation13 + $0x1], 0  ;;  %s2199_s27 = smov 0   ;;  %s2201_s28 = smov 0  }
   0xd   :  { %s2203_s29 = smov 0   ;;  %s2205_s30 = smov 0  }
   0xe LB: > { %2475 = sst [smem:[#allocation20_spill]] %s2143_s29  ;;  %s2223_s12 = sadd.s32 4294967295, %s2147_s30   ;;  %s2147_s30 = sphi %s2205_s30, %s2493_s30   ;;  %s2143_s29 = sphi %s2203_s29, %s2495_s29   ;;  %s2139_s28 = sphi %s2201_s28, %s2497_s28   ;;  %s2135_s27 = sphi %s2199_s27, %s2496_s27  }
   0xf   : > { %2476 = sst [smem:[#allocation21_spill]] %s2147_s30  ;;  %p1363_p0 = scmp.ge.s32.totalorder %s2147_s30, 1 }
  0x10   : > { %s2477_s2 = sld [smem:[#allocation25_spill]]  ;;  %p53_p1 = scmp.eq.s32.totalorder %s2223_s12, 0 }
  0x11   : > { %p246_p2 = scmp.lt.s32.totalorder %s2147_s30, 3  ;;  %s2149_s14 = smov [#allocation7]  }
  0x12   : > { %s259_s15 = sshll.u32 %s2149_s14, 4  ;;  %s2479_s3 = sld [smem:[#allocation26_spill]]  ;;  %s260_s15 = int_to_ptr.vmem [resolvable:$true] %s259_s15 }
  0x13   : > { %p2228_p3 = pnand %p1363_p0, %p246_p2  ;;  %s2481_s5 = sld [smem:[#allocation27_spill]] }
  0x14   : > { %s2150_s23 = smov [#allocation8]   ;;  %s2151_s25 = smov 128  }
  0x15   : > { %p1808_p4 = pneg %p2228_p3  ;;  %s273_s24 = sshll.u32 %s2150_s23, 4  ;;  %s274_s24 = int_to_ptr.vmem [resolvable:$true] %s273_s24 }
  0x16   : > { %s257_s11 = sshll.u32 %s2477_s2, 4  ;;  %s2152_s26 = smov 8   ;;  %s258_s11 = int_to_ptr.hbm [resolvable:$true] %s257_s11 }
  0x17   : > { %p2240_p6 = pnand %p1808_p4, %p53_p1  ;;  %s2153_s9 = smov [#allocation10]  }
  0x18   : > { %s271_s18 = sshll.u32 %s2479_s3, 4  ;;  %s290_s10 = sshll.u32 %s2153_s9, 4  ;;  %s272_s18 = int_to_ptr.hbm [resolvable:$true] %s271_s18  ;;  %s291_s10 = int_to_ptr.vmem [resolvable:$true] %s290_s10 }
  0x19   : > { %s288_s22 = sshll.u32 %s2481_s5, 4  ;;  %s1362_s14 = sadd.s32 4294967294, %s2147_s30   ;;  %s289_s22 = int_to_ptr.hbm [resolvable:$true] %s288_s22 }
  0x1a   : > { %1811 = dma.hbm_to_vmem [thread:$0]  (!%p2240_p6), %s258_s11, 2048, %s260_s15, [#allocation6], %s2151_s25, %s2151_s25, %s2152_s26  }
  0x1b   : > { %1814 = dma.hbm_to_vmem [thread:$0]  (!%p2240_p6), %s272_s18, 4096, %s274_s24, [#allocation9], %s2151_s25, %s2151_s25, %s2152_s26  }
  0x1c   : > { %1817 = dma.hbm_to_vmem [thread:$0]  (!%p2240_p6), %s289_s22, 4096, %s291_s10, [#allocation9], %s2151_s25, %s2151_s25, %s2152_s26  }
  0x1d   : > { %s2255_s16 = sadd.s32 1, %s2147_s30   ;;  %s39_s17 = sadd.s32 1, %s2143_s29 }
  0x1e   : > { %2482 = sst [smem:[#allocation22_spill]] %s2255_s16  ;;  %s36_s11 = ssub.s32 %s2147_s30, %s2255_s16 }
  0x1f   : > { %p46_p7 = scmp.ne.s32.totalorder %s2143_s29, %s2139_s28  ;;  %p37_p8 = scmp.eq.s32.totalorder %s36_s11, 0 }
  0x20   : > { %p47_p9 = scmp.eq.s32.totalorder %s2147_s30, 0  ;;  %p52_p10 = scmp.ne.s32.totalorder %s2139_s28, %s2135_s27 }
  0x21   : > { %p207_p11 = scmp.eq.s32.totalorder %s2223_s12, 1  ;;  %p213_p2 = scmp.eq.s32.totalorder %s1362_s14, 1 }
  0x22   : > { %s2267_s15 = scalar_select %p37_p8, %s2143_s29, %s39_s17  }
  0x23   : > { %p2269_p12 = por %p47_p9, %p46_p7  ;;  %p2275_p13 = por %p53_p1, %p52_p10 }
  0x24   : > { %2483 = sst [smem:[#allocation23_spill]] %s2267_s15  ;;  %p2279_p0 = por %p207_p11, %p46_p7 }
  0x25   : > { %p1835_p4 = scmp.lt.s32.totalorder %s2147_s30, 2  ;;  %s2285_s21 = sand.u32 1, %s2143_s29  }
  0x26   : > { %p2287_p6 = por %p213_p2, %p52_p10  ;;  %s1368_s23 = sshll.u32 %s2285_s21, 3 }
  0x27   : > { %s1369_s24 = sshll.u32 %s2147_s30, 3  ;;  %s311_s17 = scalar_lea.vmem [#allocation2], %s1368_s23 }
  0x28   : > { %s2487_s22 = scalar_select %p2287_p6, 1, 0 }
  0x29   : > { %s315_s9 = scalar_lea.hbm %s2458_s0, %s1369_s24  ;;  %s319_s11 = sshll.u32 %s311_s17, 4  ;;  %s320_s11 = int_to_ptr.vmem [resolvable:$true] %s319_s11 }
  0x2a   : > { %2488 = sst [smem:[#allocation24_spill]] %s2487_s22  ;;  %s317_s10 = sshll.u32 %s315_s9, 4  ;;  %s318_s10 = int_to_ptr.hbm [resolvable:$true] %s317_s10 }
  0x2b   : > { %p2298_p7 = pnand %p1835_p4, %p2269_p12  ;;  %s326_s2 = sand.u32 1, %s2147_s30  }
  0x2c   : > { %s1784_s3 = smul.u32 24, %s2285_s21  ;;  %s308_s15 = scalar_lea.sflag [#allocation3], %s2285_s21 }
  0x2d   : > { %s1785_s5 = smul.u32 24, %s2147_s30  ;;  %s1977_s29 = sshra.s32 %s318_s10, 4  ;;  %s1978_s29 = int_to_ptr.hbm [resolvable:$true] %s1977_s29 }
  0x2e   : > { %s1979_s25 = scalar_lea.hbm %s1978_s29, 8  ;;  %p1981_p9 = pneg %p2298_p7 }
  0x2f   : > { %p1980_p8 = scmp.ne.s32.totalorder %s1978_s29, %s1979_s25  ;;  %s1984_s24 = scalar_lea.hbm %s2458_s0, 16 }
  0x30   : > { %p1985_p12 = scmp.lt.s32.totalorder %s1978_s29, %s2458_s0  ;;  %p1986_p2 = scmp.lt.s32.totalorder %s1984_s24, %s1979_s25 }
  0x31   : > { %p1982_p10 = pnand %p1981_p9, %p1980_p8 }
  0x32   : > { %p1987_p4 = por %p1986_p2, %p1985_p12 }
  0x33   : > { %p1983_p11 = pneg %p1982_p10 }
  0x35   : > { %p1988_p5 = pnand %p1987_p4, %p1983_p11 }
  0x37   : > { %1991 = shalt.err (!%p1988_p5)
}
  0x38   : > { %1821 = dma.hbm_to_vmem [thread:$0]  (!%p2298_p7), %s318_s10, 128, %s320_s11, %s308_s15  }
  0x39   : > { %s335_s16 = scalar_lea.hbm %s2459_s1, %s1785_s5  ;;  %s330_s22 = scalar_lea.vmem [#allocation5], %s1784_s3 }
  0x3a   : > { %s337_s30 = sshll.u32 %s335_s16, 4  ;;  %s339_s18 = sshll.u32 %s330_s22, 4  ;;  %s338_s30 = int_to_ptr.hbm [resolvable:$true] %s337_s30  ;;  %s340_s18 = int_to_ptr.vmem [resolvable:$true] %s339_s18 }
  0x3b   : > { %s327_s23 = scalar_lea.sflag [#allocation6], %s326_s2  ;;  %s2007_s26 = sshra.s32 %s338_s30, 4  ;;  %s2008_s26 = int_to_ptr.hbm [resolvable:$true] %s2007_s26 }
  0x3c   : > { %s2009_s29 = scalar_lea.hbm %s2008_s26, 24  ;;  %s2014_s10 = scalar_lea.hbm %s2459_s1, 48 }
  0x3d   : > { %p2010_p8 = scmp.ne.s32.totalorder %s2008_s26, %s2009_s29  ;;  %p2015_p11 = scmp.lt.s32.totalorder %s2008_s26, %s2459_s1 }
  0x3e   : > { %p2016_p12 = scmp.lt.s32.totalorder %s2014_s10, %s2009_s29 }
  0x3f   : > { %p2012_p5 = pnand %p2010_p8, %p1981_p9 }
  0x40   : > { %p2017_p2 = por %p2016_p12, %p2015_p11 }
  0x41   : > { %p2013_p10 = pneg %p2012_p5 }
  0x43   : > { %p2018_p4 = pnand %p2017_p2, %p2013_p10 }
  0x45   : > { %2021 = shalt.err (!%p2018_p4)
}
  0x46   : > { %1824 = dma.hbm_to_vmem [thread:$0]  (!%p2298_p7), %s338_s30, 384, %s340_s18, %s327_s23  }
  0x47   : > { %348 = sbr.rel (%p2228_p3) target bundleno = 619 (0x26b), region = 48  ;;  %s2336_s2 = sand.u32 (!%p2228_p3), 1, %s2139_s28  }
  0x48   : > { %s1372_s3 = sshll.u32 (!%p2228_p3), %s2336_s2, 3  ;;  %s351_s16 = scalar_lea.sflag (!%p2228_p3), [#allocation3], %s2336_s2 }
  0x49   : > { %s2342_s22 = scalar_lea.vmem (!%p2228_p3), [#allocation2], %s1372_s3 }
  0x4c   : > { %2110 = dma.done.wait (%p2275_p13), %s351_s16, 128  }
  0x4d   : > { %2112 = vsyncadd (%p2275_p13), %s351_s16, 4294967168  ;;  %s360_s30 = sand.u32 1, %s2223_s12   ;;  %s1786_s13 = smul.u32 24, %s2336_s2 }
  0x4e   : > { %s361_s14 = scalar_lea.sflag [#allocation6], %s360_s30 }
  0x4f   : > { %s2352_s24 = scalar_lea.vmem [#allocation5], %s1786_s13 }
  0x50   : > { %2114 = dma.done.wait (%p2275_p13), %s361_s14, 384  }
  0x51   : > { %2116 = vsyncadd (%p2275_p13), %s361_s14, 4294966912 }
  0x52   : > { %2118 = dma.done.wait (%p53_p1), [#allocation6], 2048  }
  0x53   : > { %2120 = vsyncadd (%p53_p1), [#allocation6], 4294965248 }
  0x54   : > { %2122 = dma.done.wait (%p53_p1), [#allocation9], 8192  }
  0x55   : > { %2124 = vsyncadd (%p53_p1), [#allocation9], 4294959104  ;;  %v1435_v0 = vld [vmem:[#allocation7 + $0x70] sm:$0xf]  ;;  %v1719_v1 = vld [vmem:[#allocation7 + $0x74] sm:$0xf0] }
  0x56   : > { %v1427_v2 = vld [vmem:[#allocation7 + $0x60] sm:$0xf]  ;;  %v1436_v3 = vor.u32 %v1719_v1, %v1435_v0  ;;  %v1717_v4 = vld [vmem:[#allocation7 + $0x64] sm:$0xf0]  ;;  %v1419_v6 = vld [vmem:[#allocation7 + $0x50] sm:$0xf] }
  0x57   : > { %v1428_v5 = vor.u32 %v1717_v4, %v1427_v2  ;;  %v1715_v7 = vld [vmem:[#allocation7 + $0x54] sm:$0xf0]  ;;  %v1411_v9 = vld [vmem:[#allocation7 + $0x40] sm:$0xf]  ;;  %v1713_v10 = vld [vmem:[#allocation7 + $0x44] sm:$0xf0] }
  0x58   : > { %523 = vmatpush.bf16.msra.mxu0 %v1436_v3  ;;  %550 = vmatpush.bf16.msra.mxu2 %v1436_v3  ;;  %v1420_v8 = vor.u32 %v1715_v7, %v1419_v6  ;;  %v1412_v11 = vor.u32 %v1713_v10, %v1411_v9  ;;  %v1403_v12 = vld [vmem:[#allocation7 + $0x30] sm:$0xf]  ;;  %v1711_v13 = vld [vmem:[#allocation7 + $0x34] sm:$0xf0]  ;;  %v1395_v15 = vld [vmem:[#allocation7 + $0x20] sm:$0xf] }
  0x59   : > { %v1404_v14 = vor.u32 %v1711_v13, %v1403_v12  ;;  %v1709_v16 = vld [vmem:[#allocation7 + $0x24] sm:$0xf0]  ;;  %v1387_v18 = vld [vmem:[#allocation7 + $0x10] sm:$0xf]  ;;  %v1707_v19 = vld [vmem:[#allocation7 + $0x14] sm:$0xf0] }
  0x5a   : > { %v1396_v17 = vor.u32 %v1709_v16, %v1395_v15  ;;  %v1388_v20 = vor.u32 %v1707_v19, %v1387_v18  ;;  %v1379_v21 = vld [vmem:[#allocation7] sm:$0xf]  ;;  %v1705_v22 = vld [vmem:[#allocation7 + $0x4] sm:$0xf0]  ;;  %v424_v25 = vld [vmem:[%s2352_s24 + $0x8] sm:$0xff]  ;;  %s1787_s18 = smul.u32 24, %s2223_s12 }
  0x5b   : > { %v1380_v23 = vor.u32 %v1705_v22, %v1379_v21  ;;  %v423_v24 = vld [vmem:[%s2352_s24] sm:$0xff]  ;;  %v549_v27 = vpack.c.bf16 %v424_v25, %v424_v25  ;;  %v1437_v29 = vld [vmem:[#allocation7 + $0x78] sm:$0xf0]  ;;  %v1716_v31 = vld [vmem:[#allocation7 + $0x64] sm:$0xf]  ;;  %s1700_s23 = sshll.u32 %s2223_s12, 3 }
  0x5c   : > { %524 = vmatpush.bf16.msra.mxu0 %v1428_v5  ;;  %551 = vmatpush.bf16.msra.mxu2 %v1428_v5  ;;  %v442_v26 = vpack.c.bf16 %v423_v24, %v423_v24  ;;  %v1718_v28 = vld [vmem:[#allocation7 + $0x74] sm:$0xf]  ;;  %v1429_v32 = vld [vmem:[#allocation7 + $0x68] sm:$0xf0]  ;;  %v1421_v35 = vld [vmem:[#allocation7 + $0x58] sm:$0xf0]  ;;  %s1203_s25 = scalar_lea.hbm %s2466_s8, %s1787_s18  ;;  %s1188_s11 = scalar_lea.hbm %s2465_s7, %s1700_s23 }
  0x5d   : > { %v1440_v30 = vor.u32 %v1718_v28, %v1437_v29  ;;  %v1432_v33 = vor.u32 %v1716_v31, %v1429_v32  ;;  %v1714_v34 = vld [vmem:[#allocation7 + $0x54] sm:$0xf]  ;;  %v1712_v37 = vld [vmem:[#allocation7 + $0x44] sm:$0xf]  ;;  %v1413_v38 = vld [vmem:[#allocation7 + $0x48] sm:$0xf0] }
  0x5e   : > { %v1424_v36 = vor.u32 %v1714_v34, %v1421_v35  ;;  %v1416_v39 = vor.u32 %v1712_v37, %v1413_v38  ;;  %v1710_v40 = vld [vmem:[#allocation7 + $0x34] sm:$0xf]  ;;  %v1405_v41 = vld [vmem:[#allocation7 + $0x38] sm:$0xf0]  ;;  %v1708_v43 = vld [vmem:[#allocation7 + $0x24] sm:$0xf] }
  0x5f   : > { %536 = vmatpush.bf16.msra.mxu1 %v1440_v30  ;;  %563 = vmatpush.bf16.msra.mxu3 %v1440_v30  ;;  %v1408_v42 = vor.u32 %v1710_v40, %v1405_v41  ;;  %v1397_v44 = vld [vmem:[#allocation7 + $0x28] sm:$0xf0]  ;;  %v1706_v46 = vld [vmem:[#allocation7 + $0x14] sm:$0xf]  ;;  %v1389_v47 = vld [vmem:[#allocation7 + $0x18] sm:$0xf0] }
  0x60   : > { %525 = vmatpush.bf16.msra.mxu0 %v1420_v8  ;;  %552 = vmatpush.bf16.msra.mxu2 %v1420_v8  ;;  %v1400_v45 = vor.u32 %v1708_v43, %v1397_v44  ;;  %v1392_v48 = vor.u32 %v1706_v46, %v1389_v47  ;;  %v425_v49 = vld [vmem:[%s2352_s24 + $0x10] sm:$0xff]  ;;  %v1381_v51 = vld [vmem:[#allocation7 + $0x8] sm:$0xf0]  ;;  %v1499_v54 = vld [vmem:[#allocation8 + $0x70] sm:$0xf]  ;;  %s422_s5 = scalar_lea.vmem [#allocation12], %s1786_s13 }
  0x61   : > { %v1704_v50 = vld [vmem:[#allocation7 + $0x4] sm:$0xf]  ;;  %v576_v52 = vpack.c.bf16 %v425_v49, %v425_v49  ;;  %v1735_v55 = vld [vmem:[#allocation8 + $0x74] sm:$0xf0]  ;;  %v1491_v56 = vld [vmem:[#allocation8 + $0x60] sm:$0xf] }
  0x62   : > { %v1384_v53 = vor.u32 %v1704_v50, %v1381_v51  ;;  %v1500_v57 = vor.u32 %v1735_v55, %v1499_v54  ;;  %v1733_v58 = vld [vmem:[#allocation8 + $0x64] sm:$0xf0]  ;;  %v1734_v59 = vld [vmem:[#allocation8 + $0x74] sm:$0xf]  ;;  %v1501_v60 = vld [vmem:[#allocation8 + $0x78] sm:$0xf0] }
  0x63   : > { %537 = vmatpush.bf16.msra.mxu1 %v1432_v33  ;;  %564 = vmatpush.bf16.msra.mxu3 %v1432_v33  ;;  %v1504_v61 = vor.u32 %v1734_v59, %v1501_v60  ;;  %v1483_v62 = vld [vmem:[#allocation8 + $0x50] sm:$0xf]  ;;  %v1492_v0 = vor.u32 %v1733_v58, %v1491_v56  ;;  %v1751_v1 = vld [vmem:[#allocation8 + $0xf4] sm:$0xf0]  ;;  %v1732_v2 = vld [vmem:[#allocation8 + $0x64] sm:$0xf] }
  0x64   : > { %526 = vmatpush.bf16.msra.mxu0 %v1412_v11  ;;  %553 = vmatpush.bf16.msra.mxu2 %v1412_v11  ;;  %v1563_v63 = vld [vmem:[#allocation8 + $0xf0] sm:$0xf]  ;;  %v1731_v4 = vld [vmem:[#allocation8 + $0x54] sm:$0xf0]  ;;  %v1750_v7 = vld [vmem:[#allocation8 + $0xf4] sm:$0xf] }
  0x65   : > { %v1484_v10 = vor.u32 %v1731_v4, %v1483_v62  ;;  %v1729_v12 = vld [vmem:[#allocation8 + $0x44] sm:$0xf0]  ;;  %v1730_v16 = vld [vmem:[#allocation8 + $0x54] sm:$0xf]  ;;  %v1485_v18 = vld [vmem:[#allocation8 + $0x58] sm:$0xf0] }
  0x66   : > { %v1749_v15 = vld [vmem:[#allocation8 + $0xe4] sm:$0xf0]  ;;  %v1748_v19 = vld [vmem:[#allocation8 + $0xe4] sm:$0xf]  ;;  %v1488_v21 = vor.u32 %v1730_v16, %v1485_v18  ;;  %v1727_v24 = vld [vmem:[#allocation8 + $0x34] sm:$0xf0] }
  0x67   : > { %538 = vmatpush.bf16.msra.mxu1 %v1424_v36  ;;  %565 = vmatpush.bf16.msra.mxu3 %v1424_v36  ;;  %v1728_v28 = vld [vmem:[#allocation8 + $0x44] sm:$0xf]  ;;  %v1477_v31 = vld [vmem:[#allocation8 + $0x48] sm:$0xf0]  ;;  %v1746_v32 = vld [vmem:[#allocation8 + $0xd4] sm:$0xf] }
  0x68   : > { %527 = vmatpush.bf16.msra.mxu0 %v1404_v14  ;;  %554 = vmatpush.bf16.msra.mxu2 %v1404_v14  ;;  %v1480_v34 = vor.u32 %v1728_v28, %v1477_v31  ;;  %v1725_v37 = vld [vmem:[#allocation8 + $0x24] sm:$0xf0]  ;;  %v1726_v41 = vld [vmem:[#allocation8 + $0x34] sm:$0xf]  ;;  %v1469_v43 = vld [vmem:[#allocation8 + $0x38] sm:$0xf0] }
  0x69   : > { %v1745_v40 = vld [vmem:[#allocation8 + $0xc4] sm:$0xf0]  ;;  %v1744_v44 = vld [vmem:[#allocation8 + $0xc4] sm:$0xf]  ;;  %v1472_v46 = vor.u32 %v1726_v41, %v1469_v43  ;;  %v1723_v49 = vld [vmem:[#allocation8 + $0x14] sm:$0xf0] }
  0x6a   : > { %v1531_v50 = vld [vmem:[#allocation8 + $0xb0] sm:$0xf]  ;;  %v1724_v54 = vld [vmem:[#allocation8 + $0x24] sm:$0xf]  ;;  %v1461_v55 = vld [vmem:[#allocation8 + $0x28] sm:$0xf0] }
  0x6b   : > { %539 = vmatpush.bf16.msra.mxu1 %v1416_v39  ;;  %566 = vmatpush.bf16.msra.mxu3 %v1416_v39  ;;  %v1742_v58 = vld [vmem:[#allocation8 + $0xb4] sm:$0xf]  ;;  %v1533_v59 = vld [vmem:[#allocation8 + $0xb8] sm:$0xf0]  ;;  %v1443_v60 = vld [vmem:[#allocation8] sm:$0xf] }
  0x6c   : > { %528 = vmatpush.bf16.msra.mxu0 %v1396_v17  ;;  %555 = vmatpush.bf16.msra.mxu2 %v1396_v17  ;;  %v1536_v62 = vor.u32 %v1742_v58, %v1533_v59  ;;  %v1453_v4 = vld [vmem:[#allocation8 + $0x18] sm:$0xf0]  ;;  %v1738_v16 = vld [vmem:[#allocation8 + $0x94] sm:$0xf]  ;;  %s1205_s16 = sshll.u32 %s422_s5, 4  ;;  %s2407_s12 = scalar_lea.vmem [#allocation11], %s1372_s3  ;;  %s1206_s16 = int_to_ptr.vmem [resolvable:$true] %s1205_s16 }
  0x6d   : > { %v1695_v58 = vld [vmem:[#allocation10 + $0xf8] sm:$0xf0]  ;;  %s1190_s30 = sshll.u32 %s2407_s12, 4  ;;  %s1192_s14 = sshll.u32 %s1188_s11, 4  ;;  %s2410_s30 = int_to_ptr.vmem [resolvable:$true] %s1190_s30  ;;  %s2412_s14 = int_to_ptr.hbm [resolvable:$true] %s1192_s14 }
  0x6e   : > { %s1178_s3 = scalar_lea.sflag [#allocation13], %s2336_s2  ;;  %s2057_s21 = scalar_lea.hbm %s2466_s8, 48 }
  0x6f   : > { %540 = vmatpush.bf16.msra.mxu1 %v1408_v42  ;;  %567 = vmatpush.bf16.msra.mxu3 %v1408_v42 }
  0x70   : > { %529 = vmatpush.bf16.msra.mxu0 %v1388_v20  ;;  %556 = vmatpush.bf16.msra.mxu2 %v1388_v20 }
  0x73   : > { %541 = vmatpush.bf16.msra.mxu1 %v1400_v45  ;;  %568 = vmatpush.bf16.msra.mxu3 %v1400_v45 }
  0x74   : > { %530 = vmatpush.bf16.msra.mxu0 %v1380_v23  ;;  %557 = vmatpush.bf16.msra.mxu2 %v1380_v23 }
  0x77   : > { %531 = vmatmul.bf16.vlgmr.msra.gmra.mxu0 %v442_v26  ;;  %558 = vmatmul.bf16.vlgmr.msra.gmra.mxu2 %v549_v27 }
  0x78   : > { %577 = vmatpush.bf16.msrb.mxu0 %v1436_v3  ;;  %542 = vmatpush.bf16.msra.mxu1 %v1392_v48  ;;  %v1493_v3 = vld [vmem:[#allocation8 + $0x68] sm:$0xf0] }
  0x79   : > { %569 = vmatpush.bf16.msra.mxu3 %v1392_v48  ;;  %821 = vmatpush.bf16.msrb.mxu2 %v1500_v57  ;;  %v1496_v6 = vor.u32 %v1732_v2, %v1493_v3  ;;  %v1464_v57 = vor.u32 %v1724_v54, %v1461_v55  ;;  %v1722_v3 = vld [vmem:[#allocation8 + $0x14] sm:$0xf]  ;;  %v1693_v54 = vld [vmem:[#allocation10 + $0xf0] sm:$0xf]  ;;  %v1783_v55 = vld [vmem:[#allocation10 + $0xf4] sm:$0xf0] }
  0x7c   : > { %578 = vmatpush.bf16.msrb.mxu0 %v1428_v5  ;;  %543 = vmatpush.bf16.msra.mxu1 %v1384_v53  ;;  %v1564_v5 = vor.u32 %v1751_v1, %v1563_v63  ;;  %v1721_v63 = vld [vmem:[#allocation8 + $0x4] sm:$0xf0] }
  0x7d   : > { %570 = vmatpush.bf16.msra.mxu3 %v1384_v53  ;;  %822 = vmatpush.bf16.msrb.mxu2 %v1492_v0  ;;  %v1523_v0 = vld [vmem:[#allocation8 + $0xa0] sm:$0xf]  ;;  %v1741_v1 = vld [vmem:[#allocation8 + $0xa4] sm:$0xf0]  ;;  %v1444_v2 = vor.u32 %v1721_v63, %v1443_v60 }
  0x7e   : > { %v1781_v63 = vld [vmem:[#allocation10 + $0xe4] sm:$0xf0] }
  0x7f   : > { %544 = vmatmul.bf16.vlgmr.msra.gmra.mxu1 %v442_v26  ;;  %v1547_v26 = vld [vmem:[#allocation8 + $0xd0] sm:$0xf] }
  0x80   : > { %579 = vmatpush.bf16.msrb.mxu0 %v1420_v8  ;;  %590 = vmatpush.bf16.msrb.mxu1 %v1440_v30  ;;  %v1565_v8 = vld [vmem:[#allocation8 + $0xf8] sm:$0xf0] }
  0x81   : > { %571 = vmatmul.bf16.vlgmr.msra.gmra.mxu3 %v549_v27  ;;  %v1568_v9 = vor.u32 %v1750_v7, %v1565_v8  ;;  %823 = vmatpush.bf16.msrb.mxu2 %v1484_v10  ;;  %v1747_v27 = vld [vmem:[#allocation8 + $0xd4] sm:$0xf0]  ;;  %v1525_v7 = vld [vmem:[#allocation8 + $0xa8] sm:$0xf0] }
  0x82   : > { %834 = vmatpush.bf16.msrb.mxu3 %v1564_v5  ;;  %v1548_v30 = vor.u32 %v1747_v27, %v1547_v26  ;;  %v1740_v5 = vld [vmem:[#allocation8 + $0xa4] sm:$0xf] }
  0x83   : > { %v620_v8 = vld [vmem:[%s2342_s22] sm:$0xff]  ;;  %v1528_v10 = vor.u32 %v1740_v5, %v1525_v7  ;;  %v1767_v5 = vld [vmem:[#allocation10 + $0x74] sm:$0xf0]  ;;  %s1207_s22 = sshll.u32 %s1203_s25, 4  ;;  %s1208_s22 = int_to_ptr.hbm [resolvable:$true] %s1207_s22 }
  0x84   : > { %580 = vmatpush.bf16.msrb.mxu0 %v1412_v11  ;;  %591 = vmatpush.bf16.msrb.mxu1 %v1432_v33  ;;  %v1475_v11 = vld [vmem:[#allocation8 + $0x40] sm:$0xf]  ;;  %v1549_v33 = vld [vmem:[#allocation8 + $0xd8] sm:$0xf0]  ;;  %s2051_s13 = sshra.s32 %s1208_s22, 4  ;;  %s2052_s13 = int_to_ptr.hbm [resolvable:$true] %s2051_s13 }
  0x85   : > { %v1476_v13 = vor.u32 %v1729_v12, %v1475_v11  ;;  %v1552_v35 = vor.u32 %v1746_v32, %v1549_v33  ;;  %v1515_v11 = vld [vmem:[#allocation8 + $0x90] sm:$0xf]  ;;  %v1739_v12 = vld [vmem:[#allocation8 + $0x94] sm:$0xf0]  ;;  %s2053_s24 = scalar_lea.hbm %s2052_s13, 24  ;;  %p2058_p7 = scmp.lt.s32.totalorder %s2052_s13, %s2466_s8 }
  0x86   : > { %p2054_p1 = scmp.ne.s32.totalorder %s2052_s13, %s2053_s24  ;;  %p2059_p9 = scmp.lt.s32.totalorder %s2057_s21, %s2053_s24 }
  0x87   : > { %824 = vmatpush.bf16.msrb.mxu2 %v1476_v13  ;;  %v1720_v13 = vld [vmem:[#allocation8 + $0x4] sm:$0xf] }
  0x88   : > { %581 = vmatpush.bf16.msrb.mxu0 %v1404_v14  ;;  %592 = vmatpush.bf16.msrb.mxu1 %v1424_v36  ;;  %v1555_v14 = vld [vmem:[#allocation8 + $0xe0] sm:$0xf]  ;;  %p2055_p3 = pnand %p2054_p1, %p2279_p0  ;;  %p2060_p8 = por %p2059_p9, %p2058_p7 }
  0x89   : > { %v1459_v36 = vld [vmem:[#allocation8 + $0x20] sm:$0xf] }
  0x8a   : > { %v1460_v38 = vor.u32 %v1725_v37, %v1459_v36  ;;  %p2056_p13 = pneg %p2055_p3 }
  0x8c   : > { %582 = vmatpush.bf16.msrb.mxu0 %v1396_v17  ;;  %593 = vmatpush.bf16.msrb.mxu1 %v1416_v39  ;;  %v1556_v17 = vor.u32 %v1749_v15, %v1555_v14  ;;  %v1539_v39 = vld [vmem:[#allocation8 + $0xc0] sm:$0xf]  ;;  %v621_v14 = vpack.c.bf16 %v620_v8, %v620_v8  ;;  %v1445_v15 = vld [vmem:[#allocation8 + $0x8] sm:$0xf0]  ;;  %v1631_v8 = vld [vmem:[#allocation10 + $0x78] sm:$0xf0]  ;;  %p2061_p5 = pnand %p2060_p8, %p2056_p13 }
  0x8e   : > { %835 = vmatpush.bf16.msrb.mxu3 %v1556_v17  ;;  %v1517_v17 = vld [vmem:[#allocation8 + $0x98] sm:$0xf0] }
  0x90   : > { %583 = vmatpush.bf16.msrb.mxu0 %v1388_v20  ;;  %594 = vmatpush.bf16.msrb.mxu1 %v1408_v42  ;;  %v1557_v20 = vld [vmem:[#allocation8 + $0xe8] sm:$0xf0]  ;;  %v1540_v42 = vor.u32 %v1745_v40, %v1539_v39 }
  0x91   : > { %v1560_v22 = vor.u32 %v1748_v19, %v1557_v20  ;;  %v1516_v19 = vor.u32 %v1739_v12, %v1515_v11  ;;  %v1448_v20 = vor.u32 %v1720_v13, %v1445_v15  ;;  %v1779_v11 = vld [vmem:[#allocation10 + $0xd4] sm:$0xf0]  ;;  %v1778_v12 = vld [vmem:[#allocation10 + $0xd4] sm:$0xf] }
  0x92   : > { %836 = vmatpush.bf16.msrb.mxu3 %v1548_v30 }
  0x94   : > { %584 = vmatpush.bf16.msrb.mxu0 %v1380_v23  ;;  %595 = vmatpush.bf16.msrb.mxu1 %v1400_v45  ;;  %v1467_v23 = vld [vmem:[#allocation8 + $0x30] sm:$0xf]  ;;  %v1541_v45 = vld [vmem:[#allocation8 + $0xc8] sm:$0xf0] }
  0x95   : > { %v1468_v25 = vor.u32 %v1727_v24, %v1467_v23  ;;  %v1544_v47 = vor.u32 %v1744_v44, %v1541_v45  ;;  %v1737_v23 = vld [vmem:[#allocation8 + $0x84] sm:$0xf0]  ;;  %v1736_v24 = vld [vmem:[#allocation8 + $0x84] sm:$0xf] }
  0x96   : > { %837 = vmatpush.bf16.msrb.mxu3 %v1540_v42 }
  0x97   : > { %585 = vmatmul.bf16.vlgmr.msrb.gmra.mxu0 %v576_v52  ;;  %825 = vmatpush.bf16.msrb.mxu2 %v1468_v25  ;;  %v1509_v25 = vld [vmem:[#allocation8 + $0x88] sm:$0xf0] }
  0x98   : > { %596 = vmatpush.bf16.msrb.mxu1 %v1392_v48  ;;  %847 = vmatpush.bf16.msra.mxu0 %v1504_v61  ;;  %v1451_v48 = vld [vmem:[#allocation8 + $0x10] sm:$0xf]  ;;  %v1512_v27 = vor.u32 %v1736_v24, %v1509_v25  ;;  %v1776_v24 = vld [vmem:[#allocation10 + $0xc4] sm:$0xf] }
  0x9b   : > { %826 = vmatpush.bf16.msrb.mxu2 %v1460_v38 }
  0x9c   : > { %597 = vmatpush.bf16.msrb.mxu1 %v1384_v53  ;;  %848 = vmatpush.bf16.msra.mxu0 %v1496_v6  ;;  %v1743_v53 = vld [vmem:[#allocation8 + $0xb4] sm:$0xf0]  ;;  %v1524_v6 = vor.u32 %v1741_v1, %v1523_v0  ;;  %v1780_v0 = vld [vmem:[#allocation10 + $0xe4] sm:$0xf] }
  0x9d   : > { %v1532_v56 = vor.u32 %v1743_v53, %v1531_v50 }
  0x9f   : > { %598 = vmatmul.bf16.vlgmr.msrb.gmra.mxu1 %v576_v52  ;;  %v1452_v52 = vor.u32 %v1723_v49, %v1451_v48  ;;  %838 = vmatpush.bf16.msrb.mxu3 %v1532_v56  ;;  %v1782_v56 = vld [vmem:[#allocation10 + $0xf4] sm:$0xf] }
  0xa0   : > { %860 = vmatpush.bf16.msra.mxu1 %v1568_v9  ;;  %849 = vmatpush.bf16.msra.mxu0 %v1488_v21  ;;  %v1456_v9 = vor.u32 %v1722_v3, %v1453_v4  ;;  %v1520_v21 = vor.u32 %v1738_v16, %v1517_v17  ;;  %v1698_v59 = vor.u32 %v1782_v56, %v1695_v58  ;;  %v1629_v4 = vld [vmem:[#allocation10 + $0x70] sm:$0xf]  ;;  %v1621_v16 = vld [vmem:[#allocation10 + $0x60] sm:$0xf]  ;;  %v1765_v17 = vld [vmem:[#allocation10 + $0x64] sm:$0xf0] }
  0xa1   : > { %827 = vmatpush.bf16.msrb.mxu2 %v1452_v52  ;;  %v1630_v7 = vor.u32 %v1767_v5, %v1629_v4  ;;  %v1655_v56 = vld [vmem:[#allocation10 + $0xa8] sm:$0xf0]  ;;  %v1597_v58 = vld [vmem:[#allocation10 + $0x30] sm:$0xf]  ;;  %v1647_v5 = vld [vmem:[#allocation10 + $0x98] sm:$0xf0] }
  0xa3   : > { %839 = vmatpush.bf16.msrb.mxu3 %v1524_v6  ;;  %v1766_v6 = vld [vmem:[#allocation10 + $0x74] sm:$0xf] }
  0xa4   : > { %861 = vmatpush.bf16.msra.mxu1 %v1560_v22  ;;  %850 = vmatpush.bf16.msra.mxu0 %v1480_v34  ;;  %v1507_v22 = vld [vmem:[#allocation8 + $0x80] sm:$0xf] }
  0xa5   : > { %828 = vmatpush.bf16.msrb.mxu2 %v1444_v2  ;;  %v1508_v26 = vor.u32 %v1737_v23, %v1507_v22  ;;  %v1687_v2 = vld [vmem:[#allocation10 + $0xe8] sm:$0xf0]  ;;  %v1669_v22 = vld [vmem:[#allocation10 + $0xc0] sm:$0xf]  ;;  %v1777_v23 = vld [vmem:[#allocation10 + $0xc4] sm:$0xf0] }
  0xa6   : > { %v1690_v3 = vor.u32 %v1780_v0, %v1687_v2  ;;  %v1670_v25 = vor.u32 %v1777_v23, %v1669_v22  ;;  %v1771_v2 = vld [vmem:[#allocation10 + $0x94] sm:$0xf0]  ;;  %v1754_v23 = vld [vmem:[#allocation10 + $0x14] sm:$0xf] }
  0xa7   : > { %840 = vmatpush.bf16.msrb.mxu3 %v1516_v19  ;;  %v1622_v19 = vor.u32 %v1765_v17, %v1621_v16  ;;  %v1768_v16 = vld [vmem:[#allocation10 + $0x84] sm:$0xf]  ;;  %v1755_v22 = vld [vmem:[#allocation10 + $0x14] sm:$0xf0] }
  0xa8   : > { %862 = vmatpush.bf16.msra.mxu1 %v1552_v35  ;;  %851 = vmatpush.bf16.msra.mxu0 %v1472_v46 }
  0xa9   : > { %829 = vmatmul.bf16.vlgmr.msrb.gmra.mxu2 %v621_v14 }
  0xaa   : > { %1113 = vmatpush.bf16.msra.mxu2 %v1630_v7  ;;  %v1589_v7 = vld [vmem:[#allocation10 + $0x20] sm:$0xf] }
  0xab   : > { %841 = vmatpush.bf16.msrb.mxu3 %v1508_v26  ;;  %v1671_v26 = vld [vmem:[#allocation10 + $0xc8] sm:$0xf0] }
  0xac   : > { %863 = vmatpush.bf16.msra.mxu1 %v1544_v47  ;;  %852 = vmatpush.bf16.msra.mxu0 %v1464_v57  ;;  %v1694_v57 = vor.u32 %v1783_v55, %v1693_v54  ;;  %v1772_v54 = vld [vmem:[#allocation10 + $0xa4] sm:$0xf] }
  0xae   : > { %1114 = vmatpush.bf16.msra.mxu2 %v1622_v19  ;;  %v1639_v19 = vld [vmem:[#allocation10 + $0x88] sm:$0xf0] }
  0xaf   : > { %1126 = vmatpush.bf16.msra.mxu3 %v1694_v57  ;;  %v1658_v57 = vor.u32 %v1772_v54, %v1655_v56 }
  0xb0   : > { %864 = vmatpush.bf16.msra.mxu1 %v1536_v62  ;;  %853 = vmatpush.bf16.msra.mxu0 %v1456_v9  ;;  %v1685_v62 = vld [vmem:[#allocation10 + $0xe0] sm:$0xf]  ;;  %v1634_v9 = vor.u32 %v1766_v6, %v1631_v8  ;;  %v1757_v8 = vld [vmem:[#allocation10 + $0x24] sm:$0xf0] }
  0xb1   : > { %v1686_v1 = vor.u32 %v1781_v63, %v1685_v62  ;;  %v1599_v63 = vld [vmem:[#allocation10 + $0x38] sm:$0xf0] }
  0xb3   : > { %1127 = vmatpush.bf16.msra.mxu3 %v1686_v1  ;;  %v1645_v1 = vld [vmem:[#allocation10 + $0x90] sm:$0xf] }
  0xb4   : > { %865 = vmatpush.bf16.msra.mxu1 %v1528_v10  ;;  %854 = vmatpush.bf16.msra.mxu0 %v1448_v20  ;;  %v1677_v10 = vld [vmem:[#allocation10 + $0xd0] sm:$0xf]  ;;  %v1623_v20 = vld [vmem:[#allocation10 + $0x68] sm:$0xf0]  ;;  %v1646_v4 = vor.u32 %v1771_v2, %v1645_v1 }
  0xb5   : > { %v1678_v13 = vor.u32 %v1779_v11, %v1677_v10  ;;  %v1590_v10 = vor.u32 %v1757_v8, %v1589_v7  ;;  %v1591_v11 = vld [vmem:[#allocation10 + $0x28] sm:$0xf0] }
  0xb7   : > { %855 = vmatmul.bf16.vlgmr.msra.gmra.mxu0 %v621_v14  ;;  %v1679_v14 = vld [vmem:[#allocation10 + $0xd8] sm:$0xf0]  ;;  %1128 = vmatpush.bf16.msra.mxu3 %v1678_v13 }
  0xb8   : > { %866 = vmatpush.bf16.msra.mxu1 %v1520_v21  ;;  %1139 = vmatpush.bf16.msrb.mxu0 %v1634_v9  ;;  %v1682_v15 = vor.u32 %v1778_v12, %v1679_v14  ;;  %v1756_v9 = vld [vmem:[#allocation10 + $0x24] sm:$0xf]  ;;  %v1637_v14 = vld [vmem:[#allocation10 + $0x80] sm:$0xf] }
  0xb9   : > { %v1594_v13 = vor.u32 %v1756_v9, %v1591_v11 }
  0xbb   : > { %1129 = vmatpush.bf16.msra.mxu3 %v1670_v25 }
  0xbc   : > { %867 = vmatpush.bf16.msra.mxu1 %v1512_v27  ;;  %v1674_v27 = vor.u32 %v1776_v24, %v1671_v26  ;;  %v1583_v26 = vld [vmem:[#allocation10 + $0x18] sm:$0xf0] }
  0xc0   : > { %1152 = vmatpush.bf16.msrb.mxu1 %v1698_v59  ;;  %v1759_v59 = vld [vmem:[#allocation10 + $0x34] sm:$0xf0] }
  0xc1   : > { %v1598_v62 = vor.u32 %v1759_v59, %v1597_v58 }
  0xc4   : > { %1153 = vmatpush.bf16.msrb.mxu1 %v1690_v3  ;;  %v1770_v3 = vld [vmem:[#allocation10 + $0x94] sm:$0xf] }
  0xc5   : > { %v1650_v6 = vor.u32 %v1770_v3, %v1647_v5 }
  0xc8   : > { %1154 = vmatpush.bf16.msrb.mxu1 %v1682_v15  ;;  %v1769_v15 = vld [vmem:[#allocation10 + $0x84] sm:$0xf0] }
  0xcc   : > { %1155 = vmatpush.bf16.msrb.mxu1 %v1674_v27 }
  0xf4   : > { %v2369_v29 = vpop.f32.mrf.mxu0 }
  0xf5   : > { %v603_v28 = vmul.f32 %v2369_v29, %v2369_v29 }
  0xfa   : > { %v559_v51 = vpop.f32.mrf.mxu2 }
  0xfb   : > { %v604_v30 = vmul.f32 %v559_v51, %v559_v51 }
  0xfc   : > { %v534_v61 = vpop.f32.mrf.mxu0  ;;  %v2374_v35 = vpop.f32.mrf.mxu1 }
  0xfd   : > { %v605_v32 = vadd.f32 %v604_v30, %v603_v28  ;;  %v1613_v28 = vld [vmem:[#allocation10 + $0x50] sm:$0xf]  ;;  %v1763_v30 = vld [vmem:[#allocation10 + $0x54] sm:$0xf0] }
 0x102   : > { %v561_v18 = vpop.f32.mrf.mxu2 }
 0x103   : > { %v1764_v18 = vld [vmem:[#allocation10 + $0x64] sm:$0xf] }
 0x104   : > { %v2376_v37 = vpop.f32.mrf.mxu3  ;;  %v547_v39 = vpop.f32.mrf.mxu1  ;;  %v1626_v21 = vor.u32 %v1764_v18, %v1623_v20  ;;  %v1638_v18 = vor.u32 %v1769_v15, %v1637_v14  ;;  %v1642_v20 = vor.u32 %v1768_v16, %v1639_v19 }
 0x105   : > { %v1774_v39 = vld [vmem:[#allocation10 + $0xb4] sm:$0xf] }
 0x106   : > { %1140 = vmatpush.bf16.msrb.mxu0 %v1626_v21  ;;  %v1581_v21 = vld [vmem:[#allocation10 + $0x10] sm:$0xf] }
 0x107   : > { %v1582_v25 = vor.u32 %v1755_v22, %v1581_v21 }
 0x10c   : > { %v574_v44 = vpop.f32.mrf.mxu3 }
 0x10d   : > { %v1761_v44 = vld [vmem:[#allocation10 + $0x44] sm:$0xf0] }
 0x114   : > { %v586_v31 = vpop.f32.mrf.mxu0 }
 0x115   : > { %v606_v33 = vmul.f32 %v586_v31, %v586_v31  ;;  %v1762_v31 = vld [vmem:[#allocation10 + $0x54] sm:$0xf] }
 0x117   : > { %v607_v34 = vadd.f32 %v606_v33, %v605_v32  ;;  %v1614_v32 = vor.u32 %v1763_v30, %v1613_v28  ;;  %v1615_v33 = vld [vmem:[#allocation10 + $0x58] sm:$0xf0] }
 0x119   : > { %1877 = vrsqrt.f32 %v607_v34  ;;  %vm615_vm0 = vcmp.eq.f32.partialorder %v607_v34, inf  ;;  %v618_v46 = vand.u32 2147483648, %v607_v34  ;;  %vm617_vm1 = vcmp.eq.f32.partialorder %v607_v34, 0.0  ;;  %1115 = vmatpush.bf16.msra.mxu2 %v1614_v32  ;;  %v1753_v32 = vld [vmem:[#allocation10 + $0x4] sm:$0xf0] }
 0x11c   : > { %v588_v36 = vpop.f32.mrf.mxu0  ;;  %v2378_v50 = vpop.f32.mrf.mxu1 }
 0x11d   : > { %v1661_v36 = vld [vmem:[#allocation10 + $0xb0] sm:$0xf] }
 0x11f   : > { %v1878_v38 = vpop.eup %1877 }
 0x120   : > { %v609_v40 = vmul.f32 %v1878_v38, %v607_v34 }
 0x122   : > { %v610_v41 = vmul.f32 %v1878_v38, %v609_v40 }
 0x124   : > { %v611_v42 = vmul.f32 0.5, %v610_v41  ;;  %v601_v51 = vpop.f32.mrf.mxu1  ;;  %v1663_v41 = vld [vmem:[#allocation10 + $0xb8] sm:$0xf0] }
 0x125   : > { %v1773_v51 = vld [vmem:[#allocation10 + $0xa4] sm:$0xf0] }
 0x126   : > { %v612_v43 = vsub.f32 1.5, %v611_v42  ;;  %v1666_v42 = vor.u32 %v1774_v39, %v1663_v41 }
 0x128   : > { %v613_v45 = vmul.f32 %v1878_v38, %v612_v43  ;;  %v1775_v38 = vld [vmem:[#allocation10 + $0xb4] sm:$0xf0]  ;;  %v1605_v43 = vld [vmem:[#allocation10 + $0x40] sm:$0xf]  ;;  %1156 = vmatpush.bf16.msrb.mxu1 %v1666_v42 }
 0x129   : > { %v1662_v40 = vor.u32 %v1775_v38, %v1661_v36  ;;  %v1575_v36 = vld [vmem:[#allocation10 + $0x8] sm:$0xf0] }
 0x12a   : > { %v614_v29 = vmul.f32 %v613_v45, %v607_v34  ;;  %v1760_v45 = vld [vmem:[#allocation10 + $0x44] sm:$0xf] }
 0x12b   : > { %1130 = vmatpush.bf16.msra.mxu3 %v1662_v40 }
 0x12c   : > { %v616_v47 = vsel %vm615_vm0, %v607_v34, %v614_v29  ;;  %v2380_v52 = vpop.f32.mrf.mxu2  ;;  %v1618_v34 = vor.u32 %v1762_v31, %v1615_v33  ;;  %v655_v29 = vld [vmem:[%s2462_s4] sm:$0x3]  ;;  %1157 = vmatpush.bf16.msrb.mxu1 %v1658_v57 }
 0x12d   : > { %v619_v48 = vsel %vm617_vm1, %v618_v46, %v616_v47  ;;  %v1606_v46 = vor.u32 %v1761_v44, %v1605_v43  ;;  %v1607_v47 = vld [vmem:[#allocation10 + $0x48] sm:$0xf0]  ;;  %v657_v17 = vperm.slane %v655_v29, 0  ;;  %v1573_v31 = vld [vmem:[#allocation10] sm:$0xf] }
 0x12e   : > { %v622_v49 = vpack.c.bf16 %v619_v48, %v619_v48  ;;  %1141 = vmatpush.bf16.msrb.mxu0 %v1618_v34  ;;  %v1610_v48 = vor.u32 %v1760_v45, %v1607_v47  ;;  %v1574_v33 = vor.u32 %v1753_v32, %v1573_v31  ;;  %v1752_v34 = vld [vmem:[#allocation10 + $0x4] sm:$0xf] }
 0x12f   : > { %1116 = vmatpush.bf16.msra.mxu2 %v1606_v46  ;;  %v831_v28 = vadd.f32 %v2380_v52, %v657_v17  ;;  %v1578_v38 = vor.u32 %v1752_v34, %v1575_v36 }
 0x130   : > { %842 = vmatmul.bf16.vlgmr.msrb.gmra.mxu3 %v622_v49  ;;  %868 = vmatmul.bf16.vlgmr.msra.gmra.mxu1 %v622_v49  ;;  %v1653_v49 = vld [vmem:[#allocation10 + $0xa0] sm:$0xf] }
 0x131   : > { %v1654_v55 = vor.u32 %v1773_v51, %v1653_v49  ;;  %1158 = vmatpush.bf16.msrb.mxu1 %v1650_v6 }
 0x132   : > { %1142 = vmatpush.bf16.msrb.mxu0 %v1610_v48 }
 0x133   : > { %1131 = vmatpush.bf16.msra.mxu3 %v1654_v55  ;;  %1117 = vmatpush.bf16.msra.mxu2 %v1598_v62 }
 0x134   : > { %v2382_v53 = vpop.f32.mrf.mxu0  ;;  %v832_v60 = vpop.f32.mrf.mxu2 }
 0x135   : > { %v1758_v60 = vld [vmem:[#allocation10 + $0x34] sm:$0xf]  ;;  %1159 = vmatpush.bf16.msrb.mxu1 %v1642_v20 }
 0x136   : > { %v1602_v0 = vor.u32 %v1758_v60, %v1599_v63 }
 0x137   : > { %1132 = vmatpush.bf16.msra.mxu3 %v1646_v4  ;;  %1118 = vmatpush.bf16.msra.mxu2 %v1590_v10  ;;  %v947_v10 = vld [vmem:[%s2464_s6] sm:$0x3] }
 0x138   : > { %1143 = vmatpush.bf16.msrb.mxu0 %v1602_v0  ;;  %v950_v11 = vperm.slane %v947_v10, 1  ;;  %v949_v17 = vperm.slane %v947_v10, 0 }
 0x13b   : > { %1133 = vmatpush.bf16.msra.mxu3 %v1638_v18  ;;  %1119 = vmatpush.bf16.msra.mxu2 %v1582_v25 }
 0x13c   : > { %v858_v61 = vpop.f32.mrf.mxu0  ;;  %1144 = vmatpush.bf16.msrb.mxu0 %v1594_v13 }
 0x13d   : > { %v658_v61 = vperm.slane %v655_v29, 1 }
 0x13f   : > { %v857_v12 = vadd.f32 %v2382_v53, %v658_v61  ;;  %v1586_v53 = vor.u32 %v1754_v23, %v1583_v26  ;;  %1120 = vmatpush.bf16.msra.mxu2 %v1574_v33 }
 0x141   : > { %1145 = vmatpush.bf16.msrb.mxu0 %v1586_v53 }
 0x145   : > { %1146 = vmatpush.bf16.msrb.mxu0 %v1578_v38 }
 0x1ad   : > { %v869_v24 = vpop.f32.mrf.mxu1 }
 0x1ae   : > { %v870_v27 = vadd.f32 %v869_v24, %v857_v12 }
 0x1b0   : > { %v1570_v30 = vmul.f32 -1.442695, %v870_v27 }
 0x1b2   : > { %1879 = vpow2.f32 %v1570_v30 }
 0x1b3   : > { %v843_v39 = vpop.f32.mrf.mxu3 }
 0x1b4   : > { %v844_v40 = vadd.f32 %v843_v39, %v831_v28 }
 0x1b5   : > { %v871_v41 = vpop.f32.mrf.mxu1 }
 0x1b6   : > { %v1569_v42 = vmul.f32 -1.442695, %v844_v40 }
 0x1b8   : > { %v1880_v43 = vpop.eup %1879  ;;  %1881 = vpow2.f32 %v1569_v42 }
 0x1b9   : > { %v880_v44 = vadd.f32 1.0, %v1880_v43 }
 0x1bb   : > { %1883 = vrcp.f32 %v880_v44  ;;  %v845_v52 = vpop.f32.mrf.mxu3  ;;  %v907_v49 = vand.u32 2147483648, %v880_v44  ;;  %v905_v54 = vand.u32 2147483647, %v880_v44  ;;  %vm901_vm3 = vweird.f32 %v880_v44 }
 0x1bd   : > { %v908_v58 = vor.u32 1.1754944e-38, %v907_v49  ;;  %vm906_vm5 = vcmp.eq.f32.partialorder %v905_v54, 8.507059e+37 }
 0x1be   : > { %v1882_v45 = vpop.eup %1881 }
 0x1bf   : > { %v879_v29 = vadd.f32 1.0, %v1882_v45 }
 0x1c1   : > { %v1884_v46 = vpop.eup %1883  ;;  %1885 = vrcp.f32 %v879_v29  ;;  %v892_v62 = vand.u32 2147483648, %v879_v29  ;;  %v890_v1 = vand.u32 2147483647, %v879_v29  ;;  %vm886_vm7 = vweird.f32 %v879_v29 }
 0x1c2   : > { %v897_v47 = vmul.f32 %v1884_v46, %v880_v44  ;;  %vm902_vm2 = vweird.f32 %v1884_v46 }
 0x1c3   : > { %vm903_vm4 = vmor %vm901_vm3, %vm902_vm2  ;;  %v893_v4 = vor.u32 1.1754944e-38, %v892_v62  ;;  %vm891_vm9 = vcmp.eq.f32.partialorder %v890_v1, 8.507059e+37 }
 0x1c4   : > { %v898_v48 = vsub.f32 1.0, %v897_v47 }
 0x1c6   : > { %v899_v51 = vmul.f32 %v1884_v46, %v898_v48 }
 0x1c7   : > { %v1886_v55 = vpop.eup %1885 }
 0x1c8   : > { %v900_v56 = vadd.f32 %v1884_v46, %v899_v51  ;;  %v882_v57 = vmul.f32 %v1886_v55, %v879_v29  ;;  %vm887_vm6 = vweird.f32 %v1886_v55 }
 0x1c9   : > { %vm888_vm8 = vmor %vm886_vm7, %vm887_vm6 }
 0x1ca   : > { %v904_v59 = vsel %vm903_vm4, %v1884_v46, %v900_v56  ;;  %v883_v60 = vsub.f32 1.0, %v882_v57 }
 0x1cb   : > { %v909_v61 = vsel %vm906_vm5, %v908_v58, %v904_v59 }
 0x1cc   : > { %v912_v63 = vmul.f32 %v909_v61, %v870_v27  ;;  %v884_v0 = vmul.f32 %v1886_v55, %v883_v60 }
 0x1ce   : > { %v914_v2 = vpack.c.bf16 %v912_v63, %v912_v63  ;;  %v885_v3 = vadd.f32 %v1886_v55, %v884_v0 }
 0x1d0   : > { %v889_v5 = vsel %vm888_vm8, %v1886_v55, %v885_v3  ;;  %1134 = vmatmul.bf16.vlgmr.msra.gmra.mxu3 %v914_v2  ;;  %1160 = vmatmul.bf16.vlgmr.msrb.gmra.mxu1 %v914_v2 }
 0x1d1   : > { %v894_v6 = vsel %vm891_vm9, %v893_v4, %v889_v5 }
 0x1d2   : > { %v911_v7 = vmul.f32 %v894_v6, %v844_v40 }
 0x1d4   : > { %v913_v8 = vpack.c.bf16 %v911_v7, %v911_v7 }
 0x1d6   : > { %1121 = vmatmul.bf16.vlgmr.msra.gmra.mxu2 %v913_v8  ;;  %1147 = vmatmul.bf16.vlgmr.msrb.gmra.mxu0 %v913_v8 }
 0x24d   : > { %v1161_v9 = vpop.f32.mrf.mxu1 }
 0x253   : > { %v1135_v12 = vpop.f32.mrf.mxu3  ;;  %v1148_v13 = vpop.f32.mrf.mxu0 }
 0x254   : > { %v1149_v14 = vadd.f32 %v1148_v13, %v950_v11 }
 0x255   : > { %v1163_v15 = vpop.f32.mrf.mxu1 }
 0x256   : > { %v1162_v16 = vadd.f32 %v1161_v9, %v1149_v14 }
 0x258   : > { %v1166_v18 = vmul.f32 %v1162_v16, %v2374_v35  ;;  %v1168_v19 = vmul.f32 %v1162_v16, %v2376_v37  ;;  %v1170_v20 = vmul.f32 %v1162_v16, %v2378_v50 }
 0x259   : > { %v1122_v21 = vpop.f32.mrf.mxu2 }
 0x25a   : > { %1167 = vst [vmem:[%s422_s5] sm:$0xff] %v1166_v18  ;;  %v1123_v22 = vadd.f32 %v1122_v21, %v949_v17 }
 0x25b   : > { %1169 = vst [vmem:[%s422_s5 + $0x8] sm:$0xff] %v1168_v19  ;;  %v1137_v23 = vpop.f32.mrf.mxu3  ;;  %v1150_v35 = vpop.f32.mrf.mxu0 }
 0x25c   : > { %1171 = vst [vmem:[%s422_s5 + $0x10] sm:$0xff] %v1170_v20  ;;  %v1136_v37 = vadd.f32 %v1135_v12, %v1123_v22 }
 0x25d   : > { %2064 = shalt.err (!%p2061_p5)
}
 0x25e   : > { %1805 = dma.vmem_to_hbm [thread:$0]  (%p2279_p0), %s1206_s16, 384, %s1208_s22, %s1178_s3   ;;  %1165 = vst [vmem:[%s2407_s12] sm:$0xff] %v1136_v37 }
 0x25f   : > { %s1173_s23 = scalar_lea.sflag [#allocation4], %s2336_s2  ;;  %s2079_s26 = sshra.s32 %s2412_s14, 4  ;;  %s2080_s26 = int_to_ptr.hbm [resolvable:$true] %s2079_s26 }
 0x260   : > { %s2081_s29 = scalar_lea.hbm %s2080_s26, 8  ;;  %s2085_s10 = scalar_lea.hbm %s2465_s7, 16 }
 0x261   : > { %p2082_p10 = scmp.ne.s32.totalorder %s2080_s26, %s2081_s29  ;;  %p2086_p2 = scmp.lt.s32.totalorder %s2080_s26, %s2465_s7 }
 0x262   : > { %p2087_p4 = scmp.lt.s32.totalorder %s2085_s10, %s2081_s29 }
 0x263   : > { %p2083_p11 = pnand %p2082_p10, %p2279_p0 }
 0x264   : > { %p2088_p1 = por %p2087_p4, %p2086_p2 }
 0x265   : > { %p2084_p12 = pneg %p2083_p11 }
 0x267   : > { %p2089_p3 = pnand %p2088_p1, %p2084_p12 }
 0x269   : > { %2092 = shalt.err (!%p2089_p3)
}
 0x26a   : > { %1804 = dma.vmem_to_hbm [thread:$0]  (%p2279_p0), %s2410_s30, 128, %s2412_s14, %s1173_s23   ;;  %v1124_v50 = vpop.f32.mrf.mxu2 }
 0x26b PF: > { %s2491_s16 = sld [smem:[#allocation21_spill]]  ;;  %s1219_s22 = sand.u32 1, %s2135_s27  }
 0x26c   : > { %s1220_s12 = scalar_lea.sflag [#allocation4], %s1219_s22 }
 0x271   : > { %p2492_p13 = scmp.ge.s32.totalorder %s2491_s16, 2 }
 0x273   : > { %p1826_p7 = pnand %p2492_p13, %p2287_p6 }
 0x275   : > { %p1827_p9 = pneg %p1826_p7 }
 0x277   : > { %2126 = dma.done.wait (%p1827_p9), %s1220_s12, 128  }
 0x278   : > { %2128 = vsyncadd (%p1827_p9), %s1220_s12, 4294967168  ;;  %s1230_s3 = scalar_lea.sflag [#allocation13], %s1219_s22 }
 0x279   : > { %2130 = dma.done.wait (%p1827_p9), %s1230_s3, 384  }
 0x27a   : > { %2132 = vsyncadd (%p1827_p9), %s1230_s3, 4294966912  ;;  %s2493_s30 = sld [smem:[#allocation22_spill]]  ;;  %s2496_s27 = smov %s2139_s28 }
 0x27b   : > { %s2494_s20 = sld [smem:[#allocation20_spill]] }
 0x27c   : > { %s2495_s29 = sld [smem:[#allocation23_spill]] }
 0x280   : > { %p29_p0 = scmp.ge.s32.totalorder %s2493_s30, 4  }
 0x281   : > { %s2497_s28 = smov %s2494_s20 }
 0x282   :  { %31 = sbr.rel (!%p29_p0) target bundleno = 14 (0xe), region = 135 }
 0x287   :  { %1236 = vsyncpa [#allocation3], 1 }
 0x288   :  { %1238 = vsyncpa [#allocation3 + $0x1], 1 }
 0x289   :  { %1239 = vsyncpa [#allocation6], 1 }
 0x28a   :  { %1241 = vsyncpa [#allocation6 + $0x1], 1 }
 0x28b   :  { %1242 = vsyncpa [#allocation9], 1 }
 0x28c   :  { %1243 = vsyncpa [#allocation4], 1 }
 0x28d   :  { %1245 = vsyncpa [#allocation4 + $0x1], 1 }
 0x28e   :  { %1246 = vsyncpa [#allocation13], 1 }
 0x28f   :  { %1248 = vsyncpa [#allocation13 + $0x1], 1 }

</bundles_post_ra>
